<compile_context>
chip_gen: v5e
topology: v5e:2x2
jax: 0.10.0
libtpu: 0.0.40
codegen_flags: <defaults>
</compile_context>

<pallas_src>
import functools

import jax
import jax.numpy as jnp
import numpy as np
from jax.experimental import pallas as pl
from jax.experimental.pallas import tpu as pltpu

LANE = 128
SUBLANE = 8


def _round_up(n, m):
    return ((n + m - 1) // m) * m


def rnn_kernel(x_ref, params_ref, out_ref, *,
               seq_len, batch, dp, wp,
               whx_off, whh_off, wph_off, bh_off, bp_off):
    """Single-invocation RNN forward.

    x_ref:      (T*Bp, Dp)   time-major, flattened over (t, b), lane-padded
    params_ref: (Dp + 2*Wp + 16, Wp) packed parameter slab:
                  [whx_off : whx_off+Dp]  = Whx          (Dp, Wp)
                  [whh_off : whh_off+Wp]  = Whh.T        (Wp, Wp)
                  [wph_off : wph_off+Wp]  = Wph          (Wp, Wp)
                  [bh_off]                = bh (row 0 of an 8-row pad)
                  [bp_off]                = bp (row 0 of an 8-row pad)
    out_ref:    (Bp, Wp)     lane-dense logits tile
    """
    # ---- Carve up the parameter slab with static, tile-aligned views. -----
    whx = params_ref[whx_off:whx_off + dp, :]            # (Dp, Wp)
    whh_t = params_ref[whh_off:whh_off + wp, :]          # (Wp, Wp)
    wph = params_ref[wph_off:wph_off + wp, :]            # (Wp, Wp)
    bh = params_ref[bh_off:bh_off + 1, :]                # (1, Wp)
    bp = params_ref[bp_off:bp_off + 1, :]                # (1, Wp)

    # ---- Prologue: hoist the input projection out of the recurrence. ------
    # One dense (T*Bp, Dp) @ (Dp, Wp) matmul; bh folded in here so the
    # per-step body has no bias broadcast.
    xh_all = jnp.dot(x_ref[...], whx,
                     preferred_element_type=jnp.float32) + bh

    # ---- Serial recurrence: one matmul + tanh per step, fully unrolled. ---
    h = jnp.zeros((batch, wp), dtype=jnp.float32)
    for t in range(seq_len):                 # static trip count -> unrolled
        xh_t = xh_all[t * batch:(t + 1) * batch, :]      # sublane-aligned slice
        h = jnp.tanh(xh_t + jnp.dot(h, whh_t,
                                    preferred_element_type=jnp.float32))

    # ---- Epilogue: output projection, done once; lane-dense store. --------
    p = jnp.dot(h, wph, preferred_element_type=jnp.float32) + bp
    out_ref[...] = p.astype(out_ref.dtype)


def vanilla_rnn_forward(x, whx, whh, bh, wph, bp):
    """x: (batch, seq, input_dim) -> logits (batch, num_classes)."""
    B, T, D = x.shape
    H = whh.shape[0]
    C = wph.shape[1]

    # Lane/sublane padding targets (native (8, 128) f32 tiles).
    Dp = _round_up(D, LANE)
    Wp = _round_up(max(H, C), LANE)          # common lane width for the slab
    Bp = _round_up(B, SUBLANE)

    f32 = jnp.float32

    # ---- x: time-major, batch-padded, lane-padded, flattened over (t, b). -
    x_tm = jnp.transpose(x, (1, 0, 2)).astype(f32)                 # (T, B, D)
    x_tm = jnp.pad(x_tm, ((0, 0), (0, Bp - B), (0, Dp - D)))
    x_flat = x_tm.reshape(T * Bp, Dp)

    # ---- Pack all parameters into ONE lane-padded slab (2 DMAs total). ----
    whx_p = jnp.zeros((Dp, Wp), f32).at[:D, :H].set(whx.astype(f32))
    whh_t_p = jnp.zeros((Wp, Wp), f32).at[:H, :H].set(jnp.transpose(whh).astype(f32))
    wph_p = jnp.zeros((Wp, Wp), f32).at[:H, :C].set(wph.astype(f32))
    bh_p = jnp.zeros((SUBLANE, Wp), f32).at[0, :H].set(bh.astype(f32))
    bp_p = jnp.zeros((SUBLANE, Wp), f32).at[0, :C].set(bp.astype(f32))
    params = jnp.concatenate([whx_p, whh_t_p, wph_p, bh_p, bp_p], axis=0)

    whx_off = 0
    whh_off = Dp
    wph_off = Dp + Wp
    bh_off = Dp + 2 * Wp
    bp_off = Dp + 2 * Wp + SUBLANE

    kernel = functools.partial(
        rnn_kernel, seq_len=T, batch=Bp, dp=Dp, wp=Wp,
        whx_off=whx_off, whh_off=whh_off, wph_off=wph_off,
        bh_off=bh_off, bp_off=bp_off)

    vmem = pl.BlockSpec(memory_space=pltpu.MemorySpace.VMEM)
    out_padded = pl.pallas_call(
        kernel,
        out_shape=jax.ShapeDtypeStruct((Bp, Wp), f32),
        in_specs=[vmem, vmem],               # whole-array VMEM resident
        out_specs=vmem,
    )(x_flat, params)

    # Slice the lane-dense padded logits back to the module's (B, C).
    return out_padded[:B, :C]


def xavier_uniform(key, shape, dtype=jnp.float32):
    fan_in, fan_out = shape[0], shape[1]
    bound = float(np.sqrt(6.0 / (fan_in + fan_out)))
    return jax.random.uniform(key, shape, dtype, minval=-bound, maxval=bound)


def reference_forward(x, whx, whh, bh, wph, bp):
    B = x.shape[0]
    H = whh.shape[0]
    h = jnp.zeros((B, H), dtype=jnp.float32)
    for t in range(x.shape[1]):
        h = jnp.tanh(x[:, t] @ whx + h @ whh.T + bh)
    return h @ wph + bp


if __name__ == "__main__":
    # Small shapes implied by the module's forward: x is (batch, seq, input_dim)
    batch, seq_length, input_dim, num_hidden, num_classes = 8, 8, 16, 32, 10

    key = jax.random.PRNGKey(0)
    k_x, k_whh, k_whx, k_wph = jax.random.split(key, 4)

    x = jax.random.normal(k_x, (batch, seq_length, input_dim), dtype=jnp.float32)
    whh = xavier_uniform(k_whh, (num_hidden, num_hidden))
    whx = xavier_uniform(k_whx, (input_dim, num_hidden))
    wph = xavier_uniform(k_wph, (num_hidden, num_classes))
    bh = jnp.zeros((num_hidden,), dtype=jnp.float32)
    bp = jnp.zeros((num_classes,), dtype=jnp.float32)

    out = vanilla_rnn_forward(x, whx, whh, bh, wph, bp)
    out = jax.block_until_ready(out)

    ref = reference_forward(x, whx, whh, bh, wph, bp)
    np.testing.assert_allclose(np.asarray(out), np.asarray(ref),
                               rtol=1e-5, atol=1e-5)

    print("KERNEL_OK")
</pallas_src>

<mosaic_0001>
module attributes {stable_mosaic.version = 11 : i64} {
  func.func @rnn_kernel(%arg0: memref<64x128xf32, #tpu.memory_space<vmem>>, %arg1: memref<400x128xf32, #tpu.memory_space<vmem>>, %arg2: memref<8x128xf32, #tpu.memory_space<vmem>>) attributes {dimension_semantics = [], scalar_prefetch = 0 : i64, scratch_operands = 0 : i64, tpu.core_type = #tpu.core_type<tc>} {
    %c0 = arith.constant 0 : index
    %c0_0 = arith.constant 0 : index
    %0 = vector.load %arg1[%c0, %c0_0] : memref<400x128xf32, #tpu.memory_space<vmem>>, vector<128x128xf32>
    %c128 = arith.constant 128 : index
    %c0_1 = arith.constant 0 : index
    %1 = vector.load %arg1[%c128, %c0_1] : memref<400x128xf32, #tpu.memory_space<vmem>>, vector<128x128xf32>
    %c256 = arith.constant 256 : index
    %c0_2 = arith.constant 0 : index
    %2 = vector.load %arg1[%c256, %c0_2] : memref<400x128xf32, #tpu.memory_space<vmem>>, vector<128x128xf32>
    %c384 = arith.constant 384 : index
    %c0_3 = arith.constant 0 : index
    %3 = vector.load %arg1[%c384, %c0_3] : memref<400x128xf32, #tpu.memory_space<vmem>>, vector<1x128xf32>
    %c392 = arith.constant 392 : index
    %c0_4 = arith.constant 0 : index
    %4 = vector.load %arg1[%c392, %c0_4] : memref<400x128xf32, #tpu.memory_space<vmem>>, vector<1x128xf32>
    %c0_5 = arith.constant 0 : index
    %c0_6 = arith.constant 0 : index
    %5 = vector.load %arg0[%c0_5, %c0_6] : memref<64x128xf32, #tpu.memory_space<vmem>>, vector<64x128xf32>
    %cst = arith.constant dense<0.000000e+00> : vector<64x128xf32>
    %6 = tpu.matmul %5, %0, %cst {dimension_numbers = #tpu.dot_dimension_numbers<[1], [0], [0], [1], [0, 0, 1, 1], [], []>} : vector<64x128xf32>, vector<128x128xf32>, vector<64x128xf32> -> vector<64x128xf32>
    %7 = vector.broadcast %3 : vector<1x128xf32> to vector<64x128xf32>
    %8 = arith.addf %6, %7 : vector<64x128xf32>
    %cst_7 = arith.constant 0.000000e+00 : f32
    %9 = vector.broadcast %cst_7 : f32 to vector<8x128xf32>
    %10 = vector.extract_strided_slice %8 {offsets = [0, 0], sizes = [8, 128], strides = [1, 1]} : vector<64x128xf32> to vector<8x128xf32>
    %cst_8 = arith.constant dense<0.000000e+00> : vector<8x128xf32>
    %11 = tpu.matmul %9, %1, %cst_8 {dimension_numbers = #tpu.dot_dimension_numbers<[1], [0], [0], [1], [0, 0, 1, 1], [], []>} : vector<8x128xf32>, vector<128x128xf32>, vector<8x128xf32> -> vector<8x128xf32>
    %12 = arith.addf %10, %11 : vector<8x128xf32>
    %13 = math.tanh %12 : vector<8x128xf32>
    %14 = vector.extract_strided_slice %8 {offsets = [8, 0], sizes = [8, 128], strides = [1, 1]} : vector<64x128xf32> to vector<8x128xf32>
    %cst_9 = arith.constant dense<0.000000e+00> : vector<8x128xf32>
    %15 = tpu.matmul %13, %1, %cst_9 {dimension_numbers = #tpu.dot_dimension_numbers<[1], [0], [0], [1], [0, 0, 1, 1], [], []>} : vector<8x128xf32>, vector<128x128xf32>, vector<8x128xf32> -> vector<8x128xf32>
    %16 = arith.addf %14, %15 : vector<8x128xf32>
    %17 = math.tanh %16 : vector<8x128xf32>
    %18 = vector.extract_strided_slice %8 {offsets = [16, 0], sizes = [8, 128], strides = [1, 1]} : vector<64x128xf32> to vector<8x128xf32>
    %cst_10 = arith.constant dense<0.000000e+00> : vector<8x128xf32>
    %19 = tpu.matmul %17, %1, %cst_10 {dimension_numbers = #tpu.dot_dimension_numbers<[1], [0], [0], [1], [0, 0, 1, 1], [], []>} : vector<8x128xf32>, vector<128x128xf32>, vector<8x128xf32> -> vector<8x128xf32>
    %20 = arith.addf %18, %19 : vector<8x128xf32>
    %21 = math.tanh %20 : vector<8x128xf32>
    %22 = vector.extract_strided_slice %8 {offsets = [24, 0], sizes = [8, 128], strides = [1, 1]} : vector<64x128xf32> to vector<8x128xf32>
    %cst_11 = arith.constant dense<0.000000e+00> : vector<8x128xf32>
    %23 = tpu.matmul %21, %1, %cst_11 {dimension_numbers = #tpu.dot_dimension_numbers<[1], [0], [0], [1], [0, 0, 1, 1], [], []>} : vector<8x128xf32>, vector<128x128xf32>, vector<8x128xf32> -> vector<8x128xf32>
    %24 = arith.addf %22, %23 : vector<8x128xf32>
    %25 = math.tanh %24 : vector<8x128xf32>
    %26 = vector.extract_strided_slice %8 {offsets = [32, 0], sizes = [8, 128], strides = [1, 1]} : vector<64x128xf32> to vector<8x128xf32>
    %cst_12 = arith.constant dense<0.000000e+00> : vector<8x128xf32>
    %27 = tpu.matmul %25, %1, %cst_12 {dimension_numbers = #tpu.dot_dimension_numbers<[1], [0], [0], [1], [0, 0, 1, 1], [], []>} : vector<8x128xf32>, vector<128x128xf32>, vector<8x128xf32> -> vector<8x128xf32>
    %28 = arith.addf %26, %27 : vector<8x128xf32>
    %29 = math.tanh %28 : vector<8x128xf32>
    %30 = vector.extract_strided_slice %8 {offsets = [40, 0], sizes = [8, 128], strides = [1, 1]} : vector<64x128xf32> to vector<8x128xf32>
    %cst_13 = arith.constant dense<0.000000e+00> : vector<8x128xf32>
    %31 = tpu.matmul %29, %1, %cst_13 {dimension_numbers = #tpu.dot_dimension_numbers<[1], [0], [0], [1], [0, 0, 1, 1], [], []>} : vector<8x128xf32>, vector<128x128xf32>, vector<8x128xf32> -> vector<8x128xf32>
    %32 = arith.addf %30, %31 : vector<8x128xf32>
    %33 = math.tanh %32 : vector<8x128xf32>
    %34 = vector.extract_strided_slice %8 {offsets = [48, 0], sizes = [8, 128], strides = [1, 1]} : vector<64x128xf32> to vector<8x128xf32>
    %cst_14 = arith.constant dense<0.000000e+00> : vector<8x128xf32>
    %35 = tpu.matmul %33, %1, %cst_14 {dimension_numbers = #tpu.dot_dimension_numbers<[1], [0], [0], [1], [0, 0, 1, 1], [], []>} : vector<8x128xf32>, vector<128x128xf32>, vector<8x128xf32> -> vector<8x128xf32>
    %36 = arith.addf %34, %35 : vector<8x128xf32>
    %37 = math.tanh %36 : vector<8x128xf32>
    %38 = vector.extract_strided_slice %8 {offsets = [56, 0], sizes = [8, 128], strides = [1, 1]} : vector<64x128xf32> to vector<8x128xf32>
    %cst_15 = arith.constant dense<0.000000e+00> : vector<8x128xf32>
    %39 = tpu.matmul %37, %1, %cst_15 {dimension_numbers = #tpu.dot_dimension_numbers<[1], [0], [0], [1], [0, 0, 1, 1], [], []>} : vector<8x128xf32>, vector<128x128xf32>, vector<8x128xf32> -> vector<8x128xf32>
    %40 = arith.addf %38, %39 : vector<8x128xf32>
    %41 = math.tanh %40 : vector<8x128xf32>
    %cst_16 = arith.constant dense<0.000000e+00> : vector<8x128xf32>
    %42 = tpu.matmul %41, %2, %cst_16 {dimension_numbers = #tpu.dot_dimension_numbers<[1], [0], [0], [1], [0, 0, 1, 1], [], []>} : vector<8x128xf32>, vector<128x128xf32>, vector<8x128xf32> -> vector<8x128xf32>
    %43 = vector.broadcast %4 : vector<1x128xf32> to vector<8x128xf32>
    %44 = arith.addf %42, %43 : vector<8x128xf32>
    %c0_17 = arith.constant 0 : index
    %c0_18 = arith.constant 0 : index
    %45 = vector.load %arg2[%c0_17, %c0_18] : memref<8x128xf32, #tpu.memory_space<vmem>>, vector<8x128xf32>
    tpu.vector_store %arg2[%c0_17, %c0_18], %44 {strides = array<i32>} : memref<8x128xf32, #tpu.memory_space<vmem>>, vector<8x128xf32>,
    return
  }
}

</mosaic_0001>

<bundles_post_ra>
// kernel: tpu_custom_call.1
= control target key start
LH: loop header
LB: loop body
LE: loop exit
PB: predicated region body
PF: predicated region fallthrough
CT: control target
= control target key end

     0   :  { %7 = vsyncpa [#allocation3], 0  ;;  %s662_s0 = inlined_call_operand.hbm [shape: f32[64,128], index: 0, kind: input, shape index: {}]   ;;  %s663_s1 = inlined_call_operand.hbm [shape: f32[400,128], index: 1, kind: input, shape index: {}]   ;;  %s664_s2 = inlined_call_operand.hbm [shape: f32[8,128], index: 2, kind: output, shape index: {}]  }
   0x1   :  { %8 = vsyncpa [#allocation6], 0 }
   0x2   :  { %9 = vsyncpa [#allocation4], 0  ;;  %s14_s11 = sshll.u32 %s662_s0, 4  ;;  %s462_s12 = smov [#allocation2]   ;;  %s15_s11 = int_to_ptr.hbm [resolvable:$true] %s14_s11 }
   0x3   :  { %s16_s13 = sshll.u32 %s462_s12, 4  ;;  %s27_s16 = sshll.u32 %s663_s1, 4  ;;  %s17_s13 = int_to_ptr.vmem [resolvable:$true] %s16_s13  ;;  %s28_s16 = int_to_ptr.hbm [resolvable:$true] %s27_s16 }
   0x4   :  { %s463_s17 = smov 128   ;;  %s464_s18 = smov 8  }
   0x5   :  { %22 = dma.hbm_to_vmem [thread:$0]  %s15_s11, 1024, %s17_s13, [#allocation3], %s463_s17, %s463_s17, %s464_s18  }
   0x6   :  { %s465_s19 = smov [#allocation5]  }
   0x7   :  { %s29_s20 = sshll.u32 %s465_s19, 4  ;;  %s30_s20 = int_to_ptr.vmem [resolvable:$true] %s29_s20 }
   0x8   :  { %35 = dma.hbm_to_vmem [thread:$0]  %s28_s16, 6400, %s30_s20, [#allocation6], %s463_s17, %s463_s17, %s464_s18  }
   0x9   :  { %456 = dma.done.wait [#allocation3], 1024  }
   0xa   :  { %457 = vsyncadd [#allocation3], 4294966272 }
   0xb   :  { %458 = dma.done.wait [#allocation6], 6400  }
   0xc   :  { %459 = vsyncadd [#allocation6], 4294960896  ;;  %v59_v0 = vld [vmem:[#allocation5 + $0x78] sm:$0xff]  ;;  %v58_v1 = vld [vmem:[#allocation5 + $0x70] sm:$0xff]  ;;  %v466_v33 = vmov 0.0   ;;  %s467_s0 = smov [#allocation7]  }
   0xd   :  { %v489_v2 = vld [vmem:[#allocation5 + $0xf8] sm:$0xff]  ;;  %103 = vmatpush.msra.mxu0 %v59_v0  ;;  %v492_v3 = vld [vmem:[#allocation5 + $0xf0] sm:$0xff]  ;;  %v57_v4 = vld [vmem:[#allocation5 + $0x68] sm:$0xff]  ;;  %s347_s1 = sshll.u32 %s467_s0, 4  ;;  %s349_s23 = sshll.u32 %s664_s2, 4  ;;  %s348_s1 = int_to_ptr.vmem [resolvable:$true] %s347_s1  ;;  %s350_s23 = int_to_ptr.hbm [resolvable:$true] %s349_s23 }
   0xe   :  { %144 = vmatpush.msra.mxu1 %v489_v2  ;;  %v494_v5 = vld [vmem:[#allocation5 + $0xe8] sm:$0xff]  ;;  %166 = vmatpush.msra.mxu2 %v489_v2  ;;  %v56_v6 = vld [vmem:[#allocation5 + $0x60] sm:$0xff]  ;;  %v55_v8 = vld [vmem:[#allocation5 + $0x58] sm:$0xff] }
   0xf   :  { %188 = vmatpush.msra.mxu3 %v489_v2  ;;  %104 = vmatpush.msra.mxu0 %v58_v1  ;;  %v499_v7 = vld [vmem:[#allocation5 + $0xe0] sm:$0xff]  ;;  %v504_v9 = vld [vmem:[#allocation5 + $0xd8] sm:$0xff]  ;;  %v54_v10 = vld [vmem:[#allocation5 + $0x50] sm:$0xff] }
  0x10   :  { %145 = vmatpush.msra.mxu1 %v492_v3  ;;  %167 = vmatpush.msra.mxu2 %v492_v3  ;;  %v509_v11 = vld [vmem:[#allocation5 + $0xd0] sm:$0xff]  ;;  %v53_v12 = vld [vmem:[#allocation5 + $0x48] sm:$0xff]  ;;  %v52_v14 = vld [vmem:[#allocation5 + $0x40] sm:$0xff] }
  0x11   :  { %189 = vmatpush.msra.mxu3 %v492_v3  ;;  %105 = vmatpush.msra.mxu0 %v57_v4  ;;  %v514_v13 = vld [vmem:[#allocation5 + $0xc8] sm:$0xff]  ;;  %v519_v15 = vld [vmem:[#allocation5 + $0xc0] sm:$0xff]  ;;  %v51_v16 = vld [vmem:[#allocation5 + $0x38] sm:$0xff] }
  0x12   :  { %146 = vmatpush.msra.mxu1 %v494_v5  ;;  %168 = vmatpush.msra.mxu2 %v494_v5  ;;  %v524_v17 = vld [vmem:[#allocation5 + $0xb8] sm:$0xff]  ;;  %v50_v18 = vld [vmem:[#allocation5 + $0x30] sm:$0xff]  ;;  %v49_v20 = vld [vmem:[#allocation5 + $0x28] sm:$0xff] }
  0x13   :  { %190 = vmatpush.msra.mxu3 %v494_v5  ;;  %106 = vmatpush.msra.mxu0 %v56_v6  ;;  %v529_v19 = vld [vmem:[#allocation5 + $0xb0] sm:$0xff]  ;;  %v534_v21 = vld [vmem:[#allocation5 + $0xa8] sm:$0xff]  ;;  %v48_v22 = vld [vmem:[#allocation5 + $0x20] sm:$0xff] }
  0x14   :  { %147 = vmatpush.msra.mxu1 %v499_v7  ;;  %169 = vmatpush.msra.mxu2 %v499_v7  ;;  %v539_v23 = vld [vmem:[#allocation5 + $0xa0] sm:$0xff]  ;;  %v47_v24 = vld [vmem:[#allocation5 + $0x18] sm:$0xff]  ;;  %v46_v26 = vld [vmem:[#allocation5 + $0x10] sm:$0xff] }
  0x15   :  { %191 = vmatpush.msra.mxu3 %v499_v7  ;;  %107 = vmatpush.msra.mxu0 %v55_v8  ;;  %v544_v25 = vld [vmem:[#allocation5 + $0x98] sm:$0xff]  ;;  %v549_v27 = vld [vmem:[#allocation5 + $0x90] sm:$0xff]  ;;  %v45_v28 = vld [vmem:[#allocation5 + $0x8] sm:$0xff] }
  0x16   :  { %148 = vmatpush.msra.mxu1 %v504_v9  ;;  %170 = vmatpush.msra.mxu2 %v504_v9  ;;  %v554_v29 = vld [vmem:[#allocation5 + $0x88] sm:$0xff]  ;;  %v44_v30 = vld [vmem:[#allocation5] sm:$0xff]  ;;  %v96_v41 = vld [vmem:[#allocation2 + $0x10] sm:$0xff] }
  0x17   :  { %192 = vmatpush.msra.mxu3 %v504_v9  ;;  %108 = vmatpush.msra.mxu0 %v54_v10  ;;  %v559_v31 = vld [vmem:[#allocation5 + $0x80] sm:$0xff]  ;;  %v95_v34 = vld [vmem:[#allocation2 + $0x8] sm:$0xff]  ;;  %v97_v47 = vld [vmem:[#allocation2 + $0x18] sm:$0xff] }
  0x18   :  { %149 = vmatpush.msra.mxu1 %v509_v11  ;;  %171 = vmatpush.msra.mxu2 %v509_v11  ;;  %v94_v32 = vld [vmem:[#allocation2] sm:$0xff]  ;;  %v99_v59 = vld [vmem:[#allocation2 + $0x28] sm:$0xff]  ;;  %v100_v60 = vld [vmem:[#allocation2 + $0x30] sm:$0xff] }
  0x19   :  { %193 = vmatpush.msra.mxu3 %v509_v11  ;;  %109 = vmatpush.msra.mxu0 %v53_v12  ;;  %v649_v35 = vld [vmem:[#allocation5 + $0x180] ss:$0 sm:$0xff]  ;;  %v91_v8 = vld [vmem:[#allocation5 + $0x178] sm:$0xff] }
  0x1a   :  { %150 = vmatpush.msra.mxu1 %v514_v13  ;;  %172 = vmatpush.msra.mxu2 %v514_v13  ;;  %v98_v53 = vld [vmem:[#allocation2 + $0x20] sm:$0xff] }
  0x1b   :  { %194 = vmatpush.msra.mxu3 %v514_v13  ;;  %110 = vmatpush.msra.mxu0 %v52_v14  ;;  %v88_v12 = vld [vmem:[#allocation5 + $0x160] sm:$0xff]  ;;  %v86_v14 = vld [vmem:[#allocation5 + $0x150] sm:$0xff] }
  0x1c   :  { %151 = vmatpush.msra.mxu1 %v519_v15  ;;  %173 = vmatpush.msra.mxu2 %v519_v15 }
  0x1d   :  { %195 = vmatpush.msra.mxu3 %v519_v15  ;;  %111 = vmatpush.msra.mxu0 %v51_v16 }
  0x1e   :  { %152 = vmatpush.msra.mxu1 %v524_v17  ;;  %174 = vmatpush.msra.mxu2 %v524_v17 }
  0x1f   :  { %196 = vmatpush.msra.mxu3 %v524_v17  ;;  %112 = vmatpush.msra.mxu0 %v50_v18  ;;  %v83_v18 = vld [vmem:[#allocation5 + $0x138] sm:$0xff] }
  0x20   :  { %153 = vmatpush.msra.mxu1 %v529_v19  ;;  %175 = vmatpush.msra.mxu2 %v529_v19 }
  0x21   :  { %197 = vmatpush.msra.mxu3 %v529_v19  ;;  %113 = vmatpush.msra.mxu0 %v49_v20  ;;  %v81_v20 = vld [vmem:[#allocation5 + $0x128] sm:$0xff] }
  0x22   :  { %154 = vmatpush.msra.mxu1 %v534_v21  ;;  %176 = vmatpush.msra.mxu2 %v534_v21 }
  0x23   :  { %198 = vmatpush.msra.mxu3 %v534_v21  ;;  %114 = vmatpush.msra.mxu0 %v48_v22 }
  0x24   :  { %155 = vmatpush.msra.mxu1 %v539_v23  ;;  %177 = vmatpush.msra.mxu2 %v539_v23 }
  0x25   :  { %199 = vmatpush.msra.mxu3 %v539_v23  ;;  %115 = vmatpush.msra.mxu0 %v47_v24 }
  0x26   :  { %156 = vmatpush.msra.mxu1 %v544_v25  ;;  %178 = vmatpush.msra.mxu2 %v544_v25 }
  0x27   :  { %200 = vmatpush.msra.mxu3 %v544_v25  ;;  %116 = vmatpush.msra.mxu0 %v46_v26  ;;  %v79_v26 = vld [vmem:[#allocation5 + $0x118] sm:$0xff] }
  0x28   :  { %157 = vmatpush.msra.mxu1 %v549_v27  ;;  %179 = vmatpush.msra.mxu2 %v549_v27 }
  0x29   :  { %201 = vmatpush.msra.mxu3 %v549_v27  ;;  %117 = vmatpush.msra.mxu0 %v45_v28  ;;  %v77_v28 = vld [vmem:[#allocation5 + $0x108] sm:$0xff] }
  0x2a   :  { %158 = vmatpush.msra.mxu1 %v554_v29  ;;  %180 = vmatpush.msra.mxu2 %v554_v29 }
  0x2b   :  { %202 = vmatpush.msra.mxu3 %v554_v29  ;;  %118 = vmatpush.msra.mxu0 %v44_v30 }
  0x2c   :  { %159 = vmatpush.msra.mxu1 %v559_v31  ;;  %119 = vmatmul.f32.vlgmr.msra.gmra.mxu0 %v94_v32 }
  0x2d   :  { %160 = vmatmul.f32.vlgmr.msra.gmra.mxu1 %v466_v33  ;;  %181 = vmatpush.msra.mxu2 %v559_v31 }
  0x2e   :  { %203 = vmatpush.msra.mxu3 %v559_v31  ;;  %210 = vmatpush.msrb.mxu1 %v489_v2 }
  0x2f   :  { %232 = vmatpush.msrb.mxu2 %v489_v2  ;;  %276 = vmatpush.msrb.mxu0 %v489_v2 }
  0x30   :  { %254 = vmatpush.msrb.mxu3 %v489_v2  ;;  %211 = vmatpush.msrb.mxu1 %v492_v3 }
  0x31   :  { %233 = vmatpush.msrb.mxu2 %v492_v3  ;;  %277 = vmatpush.msrb.mxu0 %v492_v3 }
  0x32   :  { %255 = vmatpush.msrb.mxu3 %v492_v3  ;;  %212 = vmatpush.msrb.mxu1 %v494_v5 }
  0x33   :  { %234 = vmatpush.msrb.mxu2 %v494_v5  ;;  %278 = vmatpush.msrb.mxu0 %v494_v5 }
  0x34   :  { %256 = vmatpush.msrb.mxu3 %v494_v5  ;;  %213 = vmatpush.msrb.mxu1 %v499_v7 }
  0x35   :  { %235 = vmatpush.msrb.mxu2 %v499_v7  ;;  %279 = vmatpush.msrb.mxu0 %v499_v7 }
  0x36   :  { %257 = vmatpush.msrb.mxu3 %v499_v7  ;;  %214 = vmatpush.msrb.mxu1 %v504_v9 }
  0x37   :  { %236 = vmatpush.msrb.mxu2 %v504_v9  ;;  %280 = vmatpush.msrb.mxu0 %v504_v9 }
  0x38   :  { %258 = vmatpush.msrb.mxu3 %v504_v9  ;;  %215 = vmatpush.msrb.mxu1 %v509_v11 }
  0x39   :  { %237 = vmatpush.msrb.mxu2 %v509_v11  ;;  %281 = vmatpush.msrb.mxu0 %v509_v11 }
  0x3a   :  { %259 = vmatpush.msrb.mxu3 %v509_v11  ;;  %216 = vmatpush.msrb.mxu1 %v514_v13 }
  0x3b   :  { %238 = vmatpush.msrb.mxu2 %v514_v13  ;;  %282 = vmatpush.msrb.mxu0 %v514_v13 }
  0x3c   :  { %260 = vmatpush.msrb.mxu3 %v514_v13  ;;  %217 = vmatpush.msrb.mxu1 %v519_v15 }
  0x3d   :  { %239 = vmatpush.msrb.mxu2 %v519_v15  ;;  %283 = vmatpush.msrb.mxu0 %v519_v15 }
  0x3e   :  { %261 = vmatpush.msrb.mxu3 %v519_v15  ;;  %218 = vmatpush.msrb.mxu1 %v524_v17 }
  0x3f   :  { %240 = vmatpush.msrb.mxu2 %v524_v17  ;;  %284 = vmatpush.msrb.mxu0 %v524_v17 }
  0x40   :  { %262 = vmatpush.msrb.mxu3 %v524_v17  ;;  %219 = vmatpush.msrb.mxu1 %v529_v19 }
  0x41   :  { %241 = vmatpush.msrb.mxu2 %v529_v19  ;;  %285 = vmatpush.msrb.mxu0 %v529_v19 }
  0x42   :  { %263 = vmatpush.msrb.mxu3 %v529_v19  ;;  %220 = vmatpush.msrb.mxu1 %v534_v21 }
  0x43   :  { %242 = vmatpush.msrb.mxu2 %v534_v21  ;;  %286 = vmatpush.msrb.mxu0 %v534_v21 }
  0x44   :  { %264 = vmatpush.msrb.mxu3 %v534_v21  ;;  %221 = vmatpush.msrb.mxu1 %v539_v23 }
  0x45   :  { %243 = vmatpush.msrb.mxu2 %v539_v23  ;;  %287 = vmatpush.msrb.mxu0 %v539_v23 }
  0x46   :  { %265 = vmatpush.msrb.mxu3 %v539_v23  ;;  %222 = vmatpush.msrb.mxu1 %v544_v25 }
  0x47   :  { %244 = vmatpush.msrb.mxu2 %v544_v25  ;;  %288 = vmatpush.msrb.mxu0 %v544_v25 }
  0x48   :  { %266 = vmatpush.msrb.mxu3 %v544_v25  ;;  %223 = vmatpush.msrb.mxu1 %v549_v27 }
  0x49   :  { %245 = vmatpush.msrb.mxu2 %v549_v27  ;;  %289 = vmatpush.msrb.mxu0 %v549_v27 }
  0x4a   :  { %267 = vmatpush.msrb.mxu3 %v549_v27  ;;  %224 = vmatpush.msrb.mxu1 %v554_v29 }
  0x4b   :  { %246 = vmatpush.msrb.mxu2 %v554_v29  ;;  %290 = vmatpush.msrb.mxu0 %v554_v29 }
  0x4c   :  { %268 = vmatpush.msrb.mxu3 %v554_v29  ;;  %225 = vmatpush.msrb.mxu1 %v559_v31 }
  0x4d   :  { %247 = vmatpush.msrb.mxu2 %v559_v31  ;;  %291 = vmatpush.msrb.mxu0 %v559_v31 }
  0x4e   :  { %269 = vmatpush.msrb.mxu3 %v559_v31  ;;  %298 = vmatpush.msra.mxu1 %v489_v2  ;;  %v101_v2 = vld [vmem:[#allocation2 + $0x38] sm:$0xff] }
  0x4f   :  { %122 = vmatmul.f32.gmra.mxu0 %v95_v34  ;;  %v367_v34 = vld [vmem:[#allocation5 + $0x188] ss:$0 sm:$0xff] }
  0x50   :  { %299 = vmatpush.msra.mxu1 %v492_v3 }
  0x52   :  { %300 = vmatpush.msra.mxu1 %v494_v5 }
  0x54   :  { %301 = vmatpush.msra.mxu1 %v499_v7 }
  0x56   :  { %302 = vmatpush.msra.mxu1 %v504_v9  ;;  %v90_v9 = vld [vmem:[#allocation5 + $0x170] sm:$0xff] }
  0x57   :  { %125 = vmatmul.f32.gmra.mxu0 %v96_v41 }
  0x58   :  { %303 = vmatpush.msra.mxu1 %v509_v11  ;;  %v89_v11 = vld [vmem:[#allocation5 + $0x168] sm:$0xff] }
  0x5a   :  { %304 = vmatpush.msra.mxu1 %v514_v13  ;;  %v87_v13 = vld [vmem:[#allocation5 + $0x158] sm:$0xff] }
  0x5c   :  { %305 = vmatpush.msra.mxu1 %v519_v15  ;;  %v85_v15 = vld [vmem:[#allocation5 + $0x148] sm:$0xff] }
  0x5e   :  { %306 = vmatpush.msra.mxu1 %v524_v17  ;;  %v84_v17 = vld [vmem:[#allocation5 + $0x140] sm:$0xff] }
  0x5f   :  { %128 = vmatmul.f32.gmra.mxu0 %v97_v47 }
  0x60   :  { %307 = vmatpush.msra.mxu1 %v529_v19  ;;  %v82_v19 = vld [vmem:[#allocation5 + $0x130] sm:$0xff] }
  0x62   :  { %308 = vmatpush.msra.mxu1 %v534_v21 }
  0x64   :  { %309 = vmatpush.msra.mxu1 %v539_v23 }
  0x66   :  { %310 = vmatpush.msra.mxu1 %v544_v25  ;;  %v80_v25 = vld [vmem:[#allocation5 + $0x120] sm:$0xff] }
  0x67   :  { %131 = vmatmul.f32.gmra.mxu0 %v98_v53 }
  0x68   :  { %311 = vmatpush.msra.mxu1 %v549_v27  ;;  %v78_v27 = vld [vmem:[#allocation5 + $0x110] sm:$0xff] }
  0x6a   :  { %312 = vmatpush.msra.mxu1 %v554_v29  ;;  %v76_v29 = vld [vmem:[#allocation5 + $0x100] sm:$0xff] }
  0x6c   :  { %313 = vmatpush.msra.mxu1 %v559_v31 }
  0x6f   :  { %134 = vmatmul.f32.gmra.mxu0 %v99_v59 }
  0x77   :  { %137 = vmatmul.f32.gmra.mxu0 %v100_v60 }
  0x7f   :  { %140 = vmatmul.f32.gmra.mxu0 %v101_v2 }
  0xa9   :  { %v120_v36 = vpop.f32.mrf.mxu0 }
  0xaa   :  { %v161_v37 = vpop.f32.mrf.mxu1  ;;  %v121_v38 = vadd.f32 %v649_v35, %v120_v36 }
  0xac   :  { %v164_v39 = vadd.f32 %v161_v37, %v121_v38 }
  0xae   :  { %368 = vtanh.f32 %v164_v39 }
  0xb4   :  { %v369_v40 = vpop.eup %368 }
  0xb5   :  { %182 = vmatmul.f32.vlgmr.msra.gmra.mxu2 %v369_v40 }
  0xb6   :  { %321 = vmatpush.msra.mxu2 %v91_v8 }
  0xb8   :  { %322 = vmatpush.msra.mxu2 %v90_v9 }
  0xba   :  { %323 = vmatpush.msra.mxu2 %v89_v11 }
  0xbc   :  { %324 = vmatpush.msra.mxu2 %v88_v12 }
  0xbe   :  { %325 = vmatpush.msra.mxu2 %v87_v13 }
  0xc0   :  { %326 = vmatpush.msra.mxu2 %v86_v14 }
  0xc2   :  { %327 = vmatpush.msra.mxu2 %v85_v15 }
  0xc4   :  { %328 = vmatpush.msra.mxu2 %v84_v17 }
  0xc6   :  { %329 = vmatpush.msra.mxu2 %v83_v18 }
  0xc8   :  { %330 = vmatpush.msra.mxu2 %v82_v19 }
  0xca   :  { %331 = vmatpush.msra.mxu2 %v81_v20 }
  0xcc   :  { %v123_v42 = vpop.f32.mrf.mxu0  ;;  %332 = vmatpush.msra.mxu2 %v80_v25 }
  0xcd   :  { %v124_v43 = vadd.f32 %v649_v35, %v123_v42 }
  0xce   :  { %333 = vmatpush.msra.mxu2 %v79_v26 }
  0xd0   :  { %334 = vmatpush.msra.mxu2 %v78_v27 }
  0xd2   :  { %335 = vmatpush.msra.mxu2 %v77_v28 }
  0xd4   :  { %v126_v48 = vpop.f32.mrf.mxu0  ;;  %336 = vmatpush.msra.mxu2 %v76_v29 }
  0xd5   :  { %v127_v49 = vadd.f32 %v649_v35, %v126_v48 }
  0xdc   :  { %v129_v54 = vpop.f32.mrf.mxu0 }
  0xdd   :  { %v130_v55 = vadd.f32 %v649_v35, %v129_v54 }
  0xe4   :  { %v132_v61 = vpop.f32.mrf.mxu0 }
  0xe5   :  { %v133_v62 = vadd.f32 %v649_v35, %v132_v61 }
  0xec   :  { %v135_v3 = vpop.f32.mrf.mxu0 }
  0xed   :  { %v136_v4 = vadd.f32 %v649_v35, %v135_v3 }
  0xf4   :  { %v138_v10 = vpop.f32.mrf.mxu0 }
  0xf5   :  { %v139_v21 = vadd.f32 %v649_v35, %v138_v10 }
  0xfc   :  { %v141_v16 = vpop.f32.mrf.mxu0 }
  0xfd   :  { %v142_v30 = vadd.f32 %v649_v35, %v141_v16 }
 0x138   :  { %v183_v44 = vpop.f32.mrf.mxu2 }
 0x139   :  { %v186_v45 = vadd.f32 %v183_v44, %v124_v43 }
 0x13b   :  { %370 = vtanh.f32 %v186_v45 }
 0x141   :  { %v371_v46 = vpop.eup %370 }
 0x142   :  { %204 = vmatmul.f32.vlgmr.msra.gmra.mxu3 %v371_v46 }
 0x1c5   :  { %v205_v50 = vpop.f32.mrf.mxu3 }
 0x1c6   :  { %v208_v51 = vadd.f32 %v205_v50, %v127_v49 }
 0x1c8   :  { %372 = vtanh.f32 %v208_v51 }
 0x1ce   :  { %v373_v52 = vpop.eup %372 }
 0x1cf   :  { %226 = vmatmul.f32.vlgmr.msrb.gmra.mxu1 %v373_v52 }
 0x24c   :  { %v227_v56 = vpop.f32.mrf.mxu1 }
 0x24d   :  { %v230_v57 = vadd.f32 %v227_v56, %v130_v55 }
 0x24f   :  { %374 = vtanh.f32 %v230_v57 }
 0x255   :  { %v375_v58 = vpop.eup %374 }
 0x256   :  { %248 = vmatmul.f32.vlgmr.msrb.gmra.mxu2 %v375_v58 }
 0x2d9   :  { %v249_v63 = vpop.f32.mrf.mxu2 }
 0x2da   :  { %v252_v0 = vadd.f32 %v249_v63, %v133_v62 }
 0x2dc   :  { %376 = vtanh.f32 %v252_v0 }
 0x2e2   :  { %v377_v1 = vpop.eup %376 }
 0x2e3   :  { %270 = vmatmul.f32.vlgmr.msrb.gmra.mxu3 %v377_v1 }
 0x366   :  { %v271_v5 = vpop.f32.mrf.mxu3 }
 0x367   :  { %v274_v6 = vadd.f32 %v271_v5, %v136_v4 }
 0x369   :  { %378 = vtanh.f32 %v274_v6 }
 0x36f   :  { %v379_v7 = vpop.eup %378 }
 0x370   :  { %292 = vmatmul.f32.vlgmr.msrb.gmra.mxu0 %v379_v7 }
 0x3ed   :  { %v293_v22 = vpop.f32.mrf.mxu0 }
 0x3ee   :  { %v296_v23 = vadd.f32 %v293_v22, %v139_v21 }
 0x3f0   :  { %380 = vtanh.f32 %v296_v23 }
 0x3f6   :  { %v381_v24 = vpop.eup %380 }
 0x3f7   :  { %314 = vmatmul.f32.vlgmr.msra.gmra.mxu1 %v381_v24 }
 0x474   :  { %v315_v31 = vpop.f32.mrf.mxu1 }
 0x475   :  { %v318_v32 = vadd.f32 %v315_v31, %v142_v30 }
 0x477   :  { %382 = vtanh.f32 %v318_v32 }
 0x47d   :  { %v383_v33 = vpop.eup %382 }
 0x47e   :  { %337 = vmatmul.f32.vlgmr.msra.gmra.mxu2 %v383_v33 }
 0x501   :  { %v338_v36 = vpop.f32.mrf.mxu2 }
 0x502   :  { %v339_v37 = vadd.f32 %v367_v34, %v338_v36 }
 0x504   :  { %341 = vst [vmem:[#allocation7] sm:$0xff] %v339_v37 }
 0x505   :  { %352 = dma.vmem_to_hbm [thread:$0]  %s348_s1, 128, %s350_s23, [#allocation4]  }
 0x506   :  { %460 = dma.done.wait [#allocation4], 128  }
 0x507   :  { %461 = vsyncadd [#allocation4], 4294967168 }
 0x508   :  { %357 = vsyncpa [#allocation3], 1 }
 0x509   :  { %358 = vsyncpa [#allocation6], 1 }
 0x50a   :  { %359 = vsyncpa [#allocation4], 1 }

</bundles_post_ra>
